<compile_context>
chip_gen: v6e
topology: v6e:2x2x1
jax: 0.10.0
libtpu: 0.0.40
codegen_flags: <defaults>
</compile_context>

<pallas_src>
import functools

import jax
import jax.numpy as jnp
from jax import lax
from jax.experimental import pallas as pl
from jax.experimental.pallas import tpu as pltpu

_LANE = 128        # batch-tile granularity (batch lives on the lane axis)
_FEAT_ALIGN = 16   # feature-dim alignment (bf16 sublane packing)


def _round_up(n, m):
    return ((n + m - 1) // m) * m


def _elu(v):
    # ELU(alpha=1).  The positive branch of exp() is discarded by the select.
    return jnp.where(v > 0, v, jnp.exp(v) - 1.0)


# --------------------------------------------------------------------------- #
# Kernel
# --------------------------------------------------------------------------- #
def dragonnet_kernel(x_ref, wt_ref, wh_ref, wf_ref, b_ref, out_ref,
                     *, d, h_p, hy2, use_t_input):
    """One batch tile of the full DragonNet forward, batch on the lane axis.

    x_ref : [tb, d]          input tile (f32; cast to bf16 here)
    wt_ref: [3*h_p, >=h_p]   trunk weights pre-transposed: W0^T | W1^T | W2^T
    wh_ref: [2*hy2, >=h_p]   fused heads: layer1 [hy2,h_p] | layer2 [hy2,hy2] blockdiag
    wf_ref: [16, >=hy2]      final projection: from-y [8,hy2] | from-trunk [8,h_p]
    b_ref : [R, 1]           bias column (f32), rows sliced per fused layer
    out_ref:[8, tb]          rows 0/1/2 = y0_pred / y1_pred / t_pred, rows 3..7 = 0
    """
    f32 = jnp.float32
    cdt = wt_ref.dtype
    xb = x_ref[...].astype(cdt)            # [tb, d]  bf16
    bias = b_ref[...]                      # [R, 1]   f32

    # ---- common trunk: 3 x (Linear -> ELU), activations [h_p, tb] ----
    # layer 0: z^T = ELU(W0^T @ x^T + b0) -- contract x's feature (lane) axis.
    z = _elu(lax.dot_general(wt_ref[0:h_p, 0:d], xb,
                             dimension_numbers=(((1,), (1,)), ((), ())),
                             preferred_element_type=f32) + bias[0:h_p])
    z = _elu(jnp.dot(wt_ref[h_p:2 * h_p, 0:h_p], z.astype(cdt),
                     preferred_element_type=f32) + bias[h_p:2 * h_p])
    z = _elu(jnp.dot(wt_ref[2 * h_p:3 * h_p, 0:h_p], z.astype(cdt),
                     preferred_element_type=f32) + bias[2 * h_p:3 * h_p])
    zc = z.astype(cdt)                     # shared trunk features [h_p, tb]

    # ---- fused y0 || y1 heads: 2 x (Linear -> ELU), both heads at once ----
    o = 3 * h_p
    y = _elu(jnp.dot(wh_ref[0:hy2, 0:h_p], zc,
                     preferred_element_type=f32) + bias[o:o + hy2])
    y = _elu(jnp.dot(wh_ref[hy2:2 * hy2, 0:hy2], y.astype(cdt),
                     preferred_element_type=f32) + bias[o + hy2:o + 2 * hy2])

    # ---- fused final projection -> rows (y0_pred, y1_pred, t_logit, 0...) ----
    o = o + 2 * hy2
    logits = jnp.dot(wf_ref[0:8, 0:hy2], y.astype(cdt),
                     preferred_element_type=f32) + bias[o:o + 8]
    if use_t_input:
        # dragonnet: the t logit also depends on the trunk features.
        logits = logits + jnp.dot(wf_ref[8:16, 0:h_p], zc,
                                  preferred_element_type=f32)
    # tarnet: t weights were zeroed at pack time (0 @ W == 0 exactly) and the
    # extra dot is skipped statically.

    # sigmoid only on the treatment row (row 2); y rows stay linear.
    row = lax.broadcasted_iota(jnp.int32, logits.shape, 0)
    sig = pl.reciprocal(1.0 + jnp.exp(-logits), approx=True)
    out_ref[...] = jnp.where(row == 2, sig, logits)


# --------------------------------------------------------------------------- #
# Parameter packing (host side, done once)
# --------------------------------------------------------------------------- #
def pack_params(p, input_dim, h, hy, *, is_tarnet, compute_dtype=jnp.bfloat16):
    """Pack 20 DragonNet tensors into 3 pre-transposed weight slabs + 1 bias column."""
    d = int(input_dim)
    h_p = _round_up(h, _FEAT_ALIGN)
    hy_p = _round_up(hy, _FEAT_ALIGN)
    hy2 = 2 * hy_p

    def T(w):                      # stored [in, out] -> kernel wants [out, in]
        return jnp.asarray(w, jnp.float32).T

    def place(dst, w, r0, c0):
        return dst.at[r0:r0 + w.shape[0], c0:c0 + w.shape[1]].set(w)

    # trunk slab: rows [0:h_p]=W0^T (cols 0:d), [h_p:2h_p]=W1^T, [2h_p:3h_p]=W2^T
    wt = jnp.zeros((3 * h_p, max(h_p, d)), jnp.float32)
    wt = place(wt, T(p["w0"]), 0, 0)
    wt = place(wt, T(p["w1"]), h_p, 0)
    wt = place(wt, T(p["w2"]), 2 * h_p, 0)

    # fused head slab: rows [0:hy2]     = layer-1 weight [hy2, h_p] (y0 rows | y1 rows)
    #                  rows [hy2:2*hy2] = layer-2 weight [hy2, hy2] (block-diagonal)
    wh = jnp.zeros((2 * hy2, max(h_p, hy2)), jnp.float32)
    wh = place(wh, T(p["y0w0"]), 0, 0)
    wh = place(wh, T(p["y1w0"]), hy_p, 0)
    wh = place(wh, T(p["y0w1"]), hy2, 0)
    wh = place(wh, T(p["y1w1"]), hy2 + hy_p, hy_p)

    # fused final slab: rows [0:8]  = from-y projection   [8, hy2] (row0=y0, row1=y1)
    #                   rows [8:16] = from-trunk projection [8, h_p] (row2 = t weights)
    wf = jnp.zeros((16, max(hy2, h_p)), jnp.float32)
    wf = place(wf, T(p["y0w2"]), 0, 0)
    wf = place(wf, T(p["y1w2"]), 1, hy_p)
    if not is_tarnet:
        wf = place(wf, T(p["tw"]), 8 + 2, 0)

    # bias column (f32): trunk x3 | head-layer1 | head-layer2 | final(8 rows)
    rows = 3 * h_p + 2 * hy2 + 8
    b = jnp.zeros((rows, 1), jnp.float32)

    def bcol(v):
        return jnp.asarray(v, jnp.float32).reshape(-1, 1)

    b = place(b, bcol(p["b0"]), 0, 0)
    b = place(b, bcol(p["b1"]), h_p, 0)
    b = place(b, bcol(p["b2"]), 2 * h_p, 0)
    o = 3 * h_p
    b = place(b, bcol(p["y0b0"]), o, 0)
    b = place(b, bcol(p["y1b0"]), o + hy_p, 0)
    o += hy2
    b = place(b, bcol(p["y0b1"]), o, 0)
    b = place(b, bcol(p["y1b1"]), o + hy_p, 0)
    o += hy2
    b = place(b, bcol(p["y0b2"]), o, 0)        # row o   -> y0_pred bias
    b = place(b, bcol(p["y1b2"]), o + 1, 0)    # row o+1 -> y1_pred bias
    b = place(b, bcol(p["tb"]), o + 2, 0)      # row o+2 -> t logit bias

    return {
        "wt": wt.astype(compute_dtype),
        "wh": wh.astype(compute_dtype),
        "wf": wf.astype(compute_dtype),
        "b": b,
        "dims": (d, h_p, hy2),
        "use_t_input": not is_tarnet,
        "compute_dtype": compute_dtype,
    }


# --------------------------------------------------------------------------- #
# Wrapper
# --------------------------------------------------------------------------- #
def _pick_tile(batch, tile_b):
    """128-aligned batch tile, balanced tail, >=2 steps for big batches (v7x 2 TCs)."""
    tile_b = int(min(max(tile_b, _LANE), 8192))
    tb = min(tile_b, _round_up(batch, _LANE))
    tb = max(_LANE, (tb // _LANE) * _LANE)           # force multiple of 128
    steps = pl.cdiv(batch, tb)
    if steps == 1 and batch >= 4 * _LANE:            # keep both v7x cores busy
        steps = 2
    tb = _round_up(pl.cdiv(batch, steps), _LANE)     # balance -> caps tail padding
    steps = pl.cdiv(batch, tb)
    return tb, steps


def dragonnet_forward(x, packed, *, tile_b=4096):
    """x: [B, input_dim] float. Returns [B, 3] = (y0_pred, y1_pred, t_pred)."""
    d, h_p, hy2 = packed["dims"]
    B, din = x.shape
    assert din == d, f"input_dim mismatch: {din} vs packed {d}"

    tb, steps = _pick_tile(B, tile_b)
    kernel = functools.partial(dragonnet_kernel, d=d, h_p=h_p, hy2=hy2,
                               use_t_input=packed["use_t_input"])
    wt, wh, wf, b = packed["wt"], packed["wh"], packed["wf"], packed["b"]

    out_t = pl.pallas_call(
        kernel,
        out_shape=jax.ShapeDtypeStruct((8, B), jnp.float32),
        grid=(steps,),
        in_specs=[
            pl.BlockSpec((tb, d), lambda i: (i, 0)),       # x streamed over batch
            pl.BlockSpec(wt.shape, lambda i: (0, 0)),      # weights stay VMEM-resident
            pl.BlockSpec(wh.shape, lambda i: (0, 0)),
            pl.BlockSpec(wf.shape, lambda i: (0, 0)),
            pl.BlockSpec(b.shape, lambda i: (0, 0)),
        ],
        out_specs=pl.BlockSpec((8, tb), lambda i: (0, i)),  # lane-dense output
        compiler_params=pltpu.CompilerParams(
            dimension_semantics=("parallel",)),
    )(x, wt, wh, wf, b)
    # rows 0/1/2 = y0_pred / y1_pred / t_pred  ->  [B, 3]
    return out_t[:3, :].T


# --------------------------------------------------------------------------- #
# Init + reference (mirrors the PyTorch module structure)
# --------------------------------------------------------------------------- #
def init_params(key, input_dim, h, hy):
    """Weights stored [in, out] (transpose of nn.Linear.weight); biases [1, out]."""
    keys = jax.random.split(key, 20)
    k = iter(keys)

    def normal_w(din, dout):
        return (0.05 * jax.random.normal(next(k), (din, dout))).astype(jnp.float32)

    def unif_w(din, dout):
        bound = 1.0 / jnp.sqrt(jnp.float32(din))
        return jax.random.uniform(next(k), (din, dout), jnp.float32, -bound, bound)

    def unif_b(din, dout):
        bound = 1.0 / jnp.sqrt(jnp.float32(din))
        return jax.random.uniform(next(k), (1, dout), jnp.float32, -bound, bound)

    p = {}
    p["w0"], p["b0"] = normal_w(input_dim, h), unif_b(input_dim, h)
    p["w1"], p["b1"] = normal_w(h, h), unif_b(h, h)
    p["w2"], p["b2"] = normal_w(h, h), unif_b(h, h)
    p["tw"], p["tb"] = unif_w(h, 1), unif_b(h, 1)
    p["y0w0"], p["y0b0"] = unif_w(h, hy), unif_b(h, hy)
    p["y0w1"], p["y0b1"] = unif_w(hy, hy), unif_b(hy, hy)
    p["y0w2"], p["y0b2"] = unif_w(hy, 1), unif_b(hy, 1)
    p["y1w0"], p["y1b0"] = unif_w(h, hy), unif_b(h, hy)
    p["y1w1"], p["y1b1"] = unif_w(hy, hy), unif_b(hy, hy)
    p["y1w2"], p["y1b2"] = unif_w(hy, 1), unif_b(hy, 1)
    return p


def reference_forward(x, p, *, is_tarnet, compute_dtype=jnp.bfloat16):
    """Pure-JAX reference mirroring the PyTorch forward (separate heads, explicit
    concatenate), with matmul inputs cast to the same compute dtype as the kernel."""
    def lin(a, w, b):
        return jnp.dot(a.astype(compute_dtype), w.astype(compute_dtype),
                       preferred_element_type=jnp.float32) + b

    elu = lambda v: jnp.where(v > 0, v, jnp.expm1(v))
    sig = lambda v: 1.0 / (1.0 + jnp.exp(-v))

    h = elu(lin(x, p["w0"], p["b0"]))
    h = elu(lin(h, p["w1"], p["b1"]))
    h = elu(lin(h, p["w2"], p["b2"]))
    t_in = jnp.zeros_like(h) if is_tarnet else h
    t_pred = sig(lin(t_in, p["tw"], p["tb"]))
    y0 = elu(lin(h, p["y0w0"], p["y0b0"]))
    y0 = elu(lin(y0, p["y0w1"], p["y0b1"]))
    y0_pred = lin(y0, p["y0w2"], p["y0b2"])
    y1 = elu(lin(h, p["y1w0"], p["y1b0"]))
    y1 = elu(lin(y1, p["y1w1"], p["y1b1"]))
    y1_pred = lin(y1, p["y1w2"], p["y1b2"])
    return jnp.concatenate([y0_pred, y1_pred, t_pred], axis=1)


if __name__ == "__main__":
    # p = {'input_dim': 16, 'neurons_per_layer': 32, 'neurons_per_layerYs': 16}
    B, INPUT_DIM, H, HY = 8, 16, 32, 16

    key = jax.random.PRNGKey(0)
    kx, kp = jax.random.split(key)
    x = jax.random.normal(kx, (B, INPUT_DIM), dtype=jnp.float32)
    params = init_params(kp, INPUT_DIM, H, HY)

    for is_tarnet in (False, True):
        packed = pack_params(params, INPUT_DIM, H, HY, is_tarnet=is_tarnet)
        out = jax.block_until_ready(dragonnet_forward(x, packed))
        ref = reference_forward(x, params, is_tarnet=is_tarnet)
        assert out.shape == (B, 3)
        # bf16 MXU inputs (f32 accumulation) + approx-reciprocal sigmoid: loose tol.
        assert jnp.allclose(out, ref, atol=2e-2, rtol=2e-2), (
            f"mismatch vs reference (is_tarnet={is_tarnet}), "
            f"max|diff|={float(jnp.max(jnp.abs(out - ref)))}")

    print("KERNEL_OK")
</pallas_src>

<mosaic_0001>
module attributes {stable_mosaic.version = 11 : i64} {
  func.func @dragonnet_kernel(%arg0: i32, %arg1: memref<128x16xf32, #tpu.memory_space<vmem>>, %arg2: memref<96x32xbf16, #tpu.memory_space<vmem>>, %arg3: memref<64x32xbf16, #tpu.memory_space<vmem>>, %arg4: memref<16x32xbf16, #tpu.memory_space<vmem>>, %arg5: memref<168x1xf32, #tpu.memory_space<vmem>>, %arg6: memref<8x128xf32, #tpu.memory_space<vmem>>) attributes {dimension_semantics = [#tpu.dimension_semantics<parallel>], iteration_bounds = array<i64: 1>, scalar_prefetch = 0 : i64, scratch_operands = 0 : i64, tpu.core_type = #tpu.core_type<tc>, window_params = [{transform_indices = @transform_0, window_bounds = array<i64: 128, 16>}, {pipeline_mode = #tpu.pipeline_mode<synchronous>, transform_indices = @transform_1, window_bounds = array<i64: 96, 32>}, {pipeline_mode = #tpu.pipeline_mode<synchronous>, transform_indices = @transform_2, window_bounds = array<i64: 64, 32>}, {pipeline_mode = #tpu.pipeline_mode<synchronous>, transform_indices = @transform_3, window_bounds = array<i64: 16, 32>}, {pipeline_mode = #tpu.pipeline_mode<synchronous>, transform_indices = @transform_4, window_bounds = array<i64: 168, 1>}, {transform_indices = @transform_5, window_bounds = array<i64: 8, 128>}]} {
    %c0 = arith.constant 0 : index
    %c0_0 = arith.constant 0 : index
    %0 = vector.load %arg1[%c0, %c0_0] : memref<128x16xf32, #tpu.memory_space<vmem>>, vector<128x16xf32>
    %1 = arith.truncf %0 : vector<128x16xf32> to vector<128x16xbf16>
    %c0_1 = arith.constant 0 : index
    %c0_2 = arith.constant 0 : index
    %2 = vector.load %arg5[%c0_1, %c0_2] : memref<168x1xf32, #tpu.memory_space<vmem>>, vector<168x1xf32>
    %c0_3 = arith.constant 0 : index
    %c0_4 = arith.constant 0 : index
    %3 = vector.load %arg2[%c0_3, %c0_4] : memref<96x32xbf16, #tpu.memory_space<vmem>>, vector<32x16xbf16>
    %cst = arith.constant dense<0.000000e+00> : vector<32x128xf32>
    %4 = tpu.matmul %3, %1, %cst {dimension_numbers = #tpu.dot_dimension_numbers<[1], [1], [0], [0], [0, 0, 1, 0], [], []>} : vector<32x16xbf16>, vector<128x16xbf16>, vector<32x128xf32> -> vector<32x128xf32>
    %5 = vector.extract_strided_slice %2 {offsets = [0, 0], sizes = [32, 1], strides = [1, 1]} : vector<168x1xf32> to vector<32x1xf32>
    %6 = vector.broadcast %5 : vector<32x1xf32> to vector<32x128xf32>
    %7 = arith.addf %4, %6 : vector<32x128xf32>
    %cst_5 = arith.constant 0.000000e+00 : f32
    %8 = vector.broadcast %cst_5 : f32 to vector<32x128xf32>
    %9 = arith.cmpf ogt, %7, %8 : vector<32x128xf32>
    %10 = math.exp %7 : vector<32x128xf32>
    %cst_6 = arith.constant 1.000000e+00 : f32
    %11 = vector.broadcast %cst_6 : f32 to vector<32x128xf32>
    %12 = arith.subf %10, %11 : vector<32x128xf32>
    %13 = arith.select %9, %7, %12 : vector<32x128xi1>, vector<32x128xf32>
    %c32 = arith.constant 32 : index
    %c0_7 = arith.constant 0 : index
    %14 = vector.load %arg2[%c32, %c0_7] : memref<96x32xbf16, #tpu.memory_space<vmem>>, vector<32x32xbf16>
    %15 = arith.truncf %13 : vector<32x128xf32> to vector<32x128xbf16>
    %cst_8 = arith.constant dense<0.000000e+00> : vector<32x128xf32>
    %16 = tpu.matmul %14, %15, %cst_8 {dimension_numbers = #tpu.dot_dimension_numbers<[1], [0], [0], [1], [0, 0, 1, 1], [], []>} : vector<32x32xbf16>, vector<32x128xbf16>, vector<32x128xf32> -> vector<32x128xf32>
    %17 = vector.extract_strided_slice %2 {offsets = [32, 0], sizes = [32, 1], strides = [1, 1]} : vector<168x1xf32> to vector<32x1xf32>
    %18 = vector.broadcast %17 : vector<32x1xf32> to vector<32x128xf32>
    %19 = arith.addf %16, %18 : vector<32x128xf32>
    %cst_9 = arith.constant 0.000000e+00 : f32
    %20 = vector.broadcast %cst_9 : f32 to vector<32x128xf32>
    %21 = arith.cmpf ogt, %19, %20 : vector<32x128xf32>
    %22 = math.exp %19 : vector<32x128xf32>
    %cst_10 = arith.constant 1.000000e+00 : f32
    %23 = vector.broadcast %cst_10 : f32 to vector<32x128xf32>
    %24 = arith.subf %22, %23 : vector<32x128xf32>
    %25 = arith.select %21, %19, %24 : vector<32x128xi1>, vector<32x128xf32>
    %c64 = arith.constant 64 : index
    %c0_11 = arith.constant 0 : index
    %26 = vector.load %arg2[%c64, %c0_11] : memref<96x32xbf16, #tpu.memory_space<vmem>>, vector<32x32xbf16>
    %27 = arith.truncf %25 : vector<32x128xf32> to vector<32x128xbf16>
    %cst_12 = arith.constant dense<0.000000e+00> : vector<32x128xf32>
    %28 = tpu.matmul %26, %27, %cst_12 {dimension_numbers = #tpu.dot_dimension_numbers<[1], [0], [0], [1], [0, 0, 1, 1], [], []>} : vector<32x32xbf16>, vector<32x128xbf16>, vector<32x128xf32> -> vector<32x128xf32>
    %29 = vector.extract_strided_slice %2 {offsets = [64, 0], sizes = [32, 1], strides = [1, 1]} : vector<168x1xf32> to vector<32x1xf32>
    %30 = vector.broadcast %29 : vector<32x1xf32> to vector<32x128xf32>
    %31 = arith.addf %28, %30 : vector<32x128xf32>
    %cst_13 = arith.constant 0.000000e+00 : f32
    %32 = vector.broadcast %cst_13 : f32 to vector<32x128xf32>
    %33 = arith.cmpf ogt, %31, %32 : vector<32x128xf32>
    %34 = math.exp %31 : vector<32x128xf32>
    %cst_14 = arith.constant 1.000000e+00 : f32
    %35 = vector.broadcast %cst_14 : f32 to vector<32x128xf32>
    %36 = arith.subf %34, %35 : vector<32x128xf32>
    %37 = arith.select %33, %31, %36 : vector<32x128xi1>, vector<32x128xf32>
    %38 = arith.truncf %37 : vector<32x128xf32> to vector<32x128xbf16>
    %c0_15 = arith.constant 0 : index
    %c0_16 = arith.constant 0 : index
    %39 = vector.load %arg3[%c0_15, %c0_16] : memref<64x32xbf16, #tpu.memory_space<vmem>>, vector<32x32xbf16>
    %cst_17 = arith.constant dense<0.000000e+00> : vector<32x128xf32>
    %40 = tpu.matmul %39, %38, %cst_17 {dimension_numbers = #tpu.dot_dimension_numbers<[1], [0], [0], [1], [0, 0, 1, 1], [], []>} : vector<32x32xbf16>, vector<32x128xbf16>, vector<32x128xf32> -> vector<32x128xf32>
    %41 = vector.extract_strided_slice %2 {offsets = [96, 0], sizes = [32, 1], strides = [1, 1]} : vector<168x1xf32> to vector<32x1xf32>
    %42 = vector.broadcast %41 : vector<32x1xf32> to vector<32x128xf32>
    %43 = arith.addf %40, %42 : vector<32x128xf32>
    %cst_18 = arith.constant 0.000000e+00 : f32
    %44 = vector.broadcast %cst_18 : f32 to vector<32x128xf32>
    %45 = arith.cmpf ogt, %43, %44 : vector<32x128xf32>
    %46 = math.exp %43 : vector<32x128xf32>
    %cst_19 = arith.constant 1.000000e+00 : f32
    %47 = vector.broadcast %cst_19 : f32 to vector<32x128xf32>
    %48 = arith.subf %46, %47 : vector<32x128xf32>
    %49 = arith.select %45, %43, %48 : vector<32x128xi1>, vector<32x128xf32>
    %c32_20 = arith.constant 32 : index
    %c0_21 = arith.constant 0 : index
    %50 = vector.load %arg3[%c32_20, %c0_21] : memref<64x32xbf16, #tpu.memory_space<vmem>>, vector<32x32xbf16>
    %51 = arith.truncf %49 : vector<32x128xf32> to vector<32x128xbf16>
    %cst_22 = arith.constant dense<0.000000e+00> : vector<32x128xf32>
    %52 = tpu.matmul %50, %51, %cst_22 {dimension_numbers = #tpu.dot_dimension_numbers<[1], [0], [0], [1], [0, 0, 1, 1], [], []>} : vector<32x32xbf16>, vector<32x128xbf16>, vector<32x128xf32> -> vector<32x128xf32>
    %53 = vector.extract_strided_slice %2 {offsets = [128, 0], sizes = [32, 1], strides = [1, 1]} : vector<168x1xf32> to vector<32x1xf32>
    %54 = vector.broadcast %53 : vector<32x1xf32> to vector<32x128xf32>
    %55 = arith.addf %52, %54 : vector<32x128xf32>
    %cst_23 = arith.constant 0.000000e+00 : f32
    %56 = vector.broadcast %cst_23 : f32 to vector<32x128xf32>
    %57 = arith.cmpf ogt, %55, %56 : vector<32x128xf32>
    %58 = math.exp %55 : vector<32x128xf32>
    %cst_24 = arith.constant 1.000000e+00 : f32
    %59 = vector.broadcast %cst_24 : f32 to vector<32x128xf32>
    %60 = arith.subf %58, %59 : vector<32x128xf32>
    %61 = arith.select %57, %55, %60 : vector<32x128xi1>, vector<32x128xf32>
    %c0_25 = arith.constant 0 : index
    %c0_26 = arith.constant 0 : index
    %62 = vector.load %arg4[%c0_25, %c0_26] : memref<16x32xbf16, #tpu.memory_space<vmem>>, vector<8x32xbf16>
    %63 = arith.truncf %61 : vector<32x128xf32> to vector<32x128xbf16>
    %cst_27 = arith.constant dense<0.000000e+00> : vector<8x128xf32>
    %64 = tpu.matmul %62, %63, %cst_27 {dimension_numbers = #tpu.dot_dimension_numbers<[1], [0], [0], [1], [0, 0, 1, 1], [], []>} : vector<8x32xbf16>, vector<32x128xbf16>, vector<8x128xf32> -> vector<8x128xf32>
    %65 = vector.extract_strided_slice %2 {offsets = [160, 0], sizes = [8, 1], strides = [1, 1]} : vector<168x1xf32> to vector<8x1xf32>
    %66 = vector.broadcast %65 : vector<8x1xf32> to vector<8x128xf32>
    %67 = arith.addf %64, %66 : vector<8x128xf32>
    %c8 = arith.constant 8 : index
    %c0_28 = arith.constant 0 : index
    %68 = vector.load %arg4[%c8, %c0_28] : memref<16x32xbf16, #tpu.memory_space<vmem>>, vector<8x32xbf16>
    %cst_29 = arith.constant dense<0.000000e+00> : vector<8x128xf32>
    %69 = tpu.matmul %68, %38, %cst_29 {dimension_numbers = #tpu.dot_dimension_numbers<[1], [0], [0], [1], [0, 0, 1, 1], [], []>} : vector<8x32xbf16>, vector<32x128xbf16>, vector<8x128xf32> -> vector<8x128xf32>
    %70 = arith.addf %67, %69 : vector<8x128xf32>
    %71 = tpu.iota {dimensions = array<i32: 0>} : vector<8x128xi32>
    %cst_30 = arith.constant 0.000000e+00 : f32
    %72 = vector.broadcast %cst_30 : f32 to vector<8x128xf32>
    %73 = arith.subf %72, %70 : vector<8x128xf32>
    %74 = math.exp %73 : vector<8x128xf32>
    %cst_31 = arith.constant 1.000000e+00 : f32
    %75 = vector.broadcast %cst_31 : f32 to vector<8x128xf32>
    %76 = arith.addf %75, %74 : vector<8x128xf32>
    %77 = tpu.reciprocal %76 {approx = true} : vector<8x128xf32> -> vector<8x128xf32>
    %c2_i32 = arith.constant 2 : i32
    %78 = vector.broadcast %c2_i32 : i32 to vector<8x128xi32>
    %79 = arith.cmpi eq, %71, %78 : vector<8x128xi32>
    %80 = arith.select %79, %77, %70 : vector<8x128xi1>, vector<8x128xf32>
    %c0_32 = arith.constant 0 : index
    %c0_33 = arith.constant 0 : index
    %81 = vector.load %arg6[%c0_32, %c0_33] : memref<8x128xf32, #tpu.memory_space<vmem>>, vector<8x128xf32>
    tpu.vector_store %arg6[%c0_32, %c0_33], %80 {strides = array<i32>} : memref<8x128xf32, #tpu.memory_space<vmem>>, vector<8x128xf32>,
    return
  }
  func.func @transform_0(%arg0: i32) -> (i32, i32) {
    %c0_i32 = arith.constant 0 : i32
    %c0_i32_0 = arith.constant 0 : i32
    return %arg0, %c0_i32 : i32, i32
  }
  func.func @transform_1(%arg0: i32) -> (i32, i32) {
    %c0_i32 = arith.constant 0 : i32
    %c0_i32_0 = arith.constant 0 : i32
    %c0_i32_1 = arith.constant 0 : i32
    return %c0_i32, %c0_i32_0 : i32, i32
  }
  func.func @transform_2(%arg0: i32) -> (i32, i32) {
    %c0_i32 = arith.constant 0 : i32
    %c0_i32_0 = arith.constant 0 : i32
    %c0_i32_1 = arith.constant 0 : i32
    return %c0_i32, %c0_i32_0 : i32, i32
  }
  func.func @transform_3(%arg0: i32) -> (i32, i32) {
    %c0_i32 = arith.constant 0 : i32
    %c0_i32_0 = arith.constant 0 : i32
    %c0_i32_1 = arith.constant 0 : i32
    return %c0_i32, %c0_i32_0 : i32, i32
  }
  func.func @transform_4(%arg0: i32) -> (i32, i32) {
    %c0_i32 = arith.constant 0 : i32
    %c0_i32_0 = arith.constant 0 : i32
    %c0_i32_1 = arith.constant 0 : i32
    return %c0_i32, %c0_i32_0 : i32, i32
  }
  func.func @transform_5(%arg0: i32) -> (i32, i32) {
    %c0_i32 = arith.constant 0 : i32
    %c0_i32_0 = arith.constant 0 : i32
    return %c0_i32, %arg0 : i32, i32
  }
}

</mosaic_0001>

<bundles_post_ra>
// kernel: tpu_custom_call.1
= control target key start
LH: loop header
LB: loop body
LE: loop exit
PB: predicated region body
PF: predicated region fallthrough
CT: control target
= control target key end

     0   :  { %vm101_vm0 = vcmask 130048   ;;  %v998_v5 = vmov 0   ;;  %s1222_s0 = inlined_call_operand.vmem [shape: f32[8,16], index: 0, kind: input, shape index: {}]   ;;  %s1223_s1 = inlined_call_operand.vmem [shape: bf16[96,32], index: 1, kind: input, shape index: {}]   ;;  %s1224_s2 = inlined_call_operand.vmem [shape: bf16[64,32], index: 2, kind: input, shape index: {}]   ;;  %s1225_s3 = inlined_call_operand.vmem [shape: bf16[16,32], index: 3, kind: input, shape index: {}]   ;;  %s1226_s4 = inlined_call_operand.vmem [shape: f32[168,1], index: 4, kind: input, shape index: {}]   ;;  %s1227_s5 = inlined_call_operand.hbm [shape: f32[8,8], index: 5, kind: output, shape index: {}]  }
   0x1   :  { %v36_v0 = vld [vmem:[%s1222_s0 + $0x70] sm:$0xff]  ;;  %v37_v1 = vld [vmem:[%s1222_s0 + $0x78] sm:$0xff]  ;;  %v34_v2 = vld [vmem:[%s1222_s0 + $0x60] sm:$0xff]  ;;  %920 = vset.pattern.permute.xlu0 %v998_v5  ;;  %921 = vset.pattern.permute.xlu1 %v998_v5 }
   0x2   :  { %v45_v3 = vpack.c.bf16 %v37_v1, %v36_v0  ;;  %v35_v4 = vld [vmem:[%s1222_s0 + $0x68] sm:$0xff]  ;;  %v32_v8 = vld [vmem:[%s1222_s0 + $0x50] sm:$0xff]  ;;  %v33_v9 = vld [vmem:[%s1222_s0 + $0x58] sm:$0xff] }
   0x3   :  { %v44_v6 = vpack.c.bf16 %v35_v4, %v34_v2  ;;  %v922_v10 = vld [vmem:[%s1223_s1] sm:$0xff]   ;;  %v48_v11 = vld [vmem:[%s1226_s4 + $0x10] sm:$0xff]  ;;  %v43_v14 = vpack.c.bf16 %v33_v9, %v32_v8  ;;  %v49_v15 = vld [vmem:[%s1226_s4 + $0x18] sm:$0xff] }
   0x4   :  { %908 = vmatprep.subr.msk.bf16.mxu0 %vm101_vm0, %v45_v3  ;;  %v130_v7 = vsel %vm101_vm0, %v45_v3, 0  ;;  %856 = vmatprep.mubr.msk.bf16.mxu0 %vm101_vm0, %v922_v10  ;;  %v46_v12 = vld [vmem:[%s1226_s4] sm:$0xff]  ;;  %v47_v16 = vld [vmem:[%s1226_s4 + $0x8] sm:$0xff]  ;;  %v52_v19 = vld [vmem:[%s1226_s4 + $0x30] sm:$0xff] }
   0x5   :  { %841 = vmatpush3.bf16.xpose.msra.mxu0 %v130_v7  ;;  %83 = vperm.xlu0 %920, %v48_v11   ;;  %v127_v13 = vsel %vm101_vm0, %v44_v6, 0  ;;  %v30_v17 = vld [vmem:[%s1222_s0 + $0x40] sm:$0xff]  ;;  %v31_v18 = vld [vmem:[%s1222_s0 + $0x48] sm:$0xff]  ;;  %v124_v20 = vsel %vm101_vm0, %v43_v14, 0  ;;  %v53_v21 = vld [vmem:[%s1226_s4 + $0x38] sm:$0xff] }
   0x6   :  { %909 = vmatprep.subr.msk.bf16.mxu0 %vm101_vm0, %v44_v6  ;;  %73 = vperm.xlu1 %921, %v46_v12   ;;  %v50_v22 = vld [vmem:[%s1226_s4 + $0x20] sm:$0xff]  ;;  %v51_v23 = vld [vmem:[%s1226_s4 + $0x28] sm:$0xff]  ;;  %v42_v24 = vpack.c.bf16 %v31_v18, %v30_v17 }
   0x9   :  { %88 = vperm.xlu0 %920, %v49_v15  }
   0xa   :  { %78 = vperm.xlu1 %921, %v47_v16  }
   0xd   :  { %843 = vmatpush3.bf16.xpose.msra.mxu0 %v127_v13  ;;  %219 = vperm.xlu0 %920, %v52_v19  }
   0xe   :  { %910 = vmatprep.subr.msk.bf16.mxu0 %vm101_vm0, %v43_v14  ;;  %224 = vperm.xlu1 %921, %v53_v21  }
   0xf   :  { %10 = vsyncpa [#allocation3], 0  ;;  %v56_v25 = vld [vmem:[%s1226_s4 + $0x50] sm:$0xff]  ;;  %v29_v27 = vld [vmem:[%s1222_s0 + $0x38] sm:$0xff]  ;;  %v121_v29 = vsel %vm101_vm0, %v42_v24, 0  ;;  %vm237_vm1 = vcmask 261120  }
  0x10   :  { %v28_v26 = vld [vmem:[%s1222_s0 + $0x30] sm:$0xff]  ;;  %v57_v28 = vld [vmem:[%s1226_s4 + $0x58] sm:$0xff]  ;;  %v54_v31 = vld [vmem:[%s1226_s4 + $0x40] sm:$0xff] }
  0x11   :  { %209 = vperm.xlu0 %920, %v50_v22   ;;  %v41_v30 = vpack.c.bf16 %v29_v27, %v28_v26  ;;  %v55_v32 = vld [vmem:[%s1226_s4 + $0x48] sm:$0xff]  ;;  %v60_v33 = vld [vmem:[%s1226_s4 + $0x70] sm:$0xff]  ;;  %v26_v34 = vld [vmem:[%s1222_s0 + $0x20] sm:$0xff] }
  0x12   :  { %214 = vperm.xlu1 %921, %v51_v23   ;;  %v27_v35 = vld [vmem:[%s1222_s0 + $0x28] sm:$0xff]  ;;  %v61_v36 = vld [vmem:[%s1226_s4 + $0x78] sm:$0xff]  ;;  %v58_v39 = vld [vmem:[%s1226_s4 + $0x60] sm:$0xff] }
  0x13   :  { %v118_v37 = vsel %vm101_vm0, %v41_v30, 0  ;;  %v40_v38 = vpack.c.bf16 %v27_v35, %v26_v34  ;;  %v59_v40 = vld [vmem:[%s1226_s4 + $0x68] sm:$0xff]  ;;  %v64_v41 = vld [vmem:[%s1226_s4 + $0x90] sm:$0xff]  ;;  %v25_v43 = vld [vmem:[%s1222_s0 + $0x18] sm:$0xff] }
  0x14   :  { %v24_v42 = vld [vmem:[%s1222_s0 + $0x10] sm:$0xff]  ;;  %v65_v44 = vld [vmem:[%s1226_s4 + $0x98] sm:$0xff]  ;;  %v62_v47 = vld [vmem:[%s1226_s4 + $0x80] sm:$0xff] }
  0x15   :  { %845 = vmatpush3.bf16.xpose.msra.mxu0 %v124_v20  ;;  %331 = vperm.xlu0 %920, %v56_v25   ;;  %v115_v45 = vsel %vm101_vm0, %v40_v38, 0  ;;  %v39_v46 = vpack.c.bf16 %v25_v43, %v24_v42  ;;  %v63_v48 = vld [vmem:[%s1226_s4 + $0x88] sm:$0xff]  ;;  %v66_v49 = vld [vmem:[%s1226_s4 + $0xa0] sm:$0xff]  ;;  %v924_v56 = vld [vmem:[%s1223_s1 + $0x10] sm:$0xff]  }
  0x16   :  { %911 = vmatprep.subr.msk.bf16.mxu0 %vm101_vm0, %v42_v24  ;;  %336 = vperm.xlu1 %921, %v57_v28   ;;  %v22_v50 = vld [vmem:[%s1222_s0] sm:$0xff]  ;;  %v23_v51 = vld [vmem:[%s1222_s0 + $0x8] sm:$0xff]  ;;  %v925_v23 = vld [vmem:[%s1223_s1 + $0x18] sm:$0xff]  }
  0x17   :  { %v112_v52 = vsel %vm101_vm0, %v39_v46, 0  ;;  %v38_v53 = vpack.c.bf16 %v23_v51, %v22_v50  ;;  %v923_v55 = vld [vmem:[%s1223_s1 + $0x8] sm:$0xff]   ;;  %864 = vmatprep.mubr.msk.bf16.mxu1 %vm237_vm1, %v924_v56  ;;  %v926_v24 = vld [vmem:[%s1223_s1 + $0x20] sm:$0xff]  }
  0x18   :  { %v928_v56 = vld [vmem:[%s1224_s2] sm:$0xff]  }
  0x19   :  { %321 = vperm.xlu0 %920, %v54_v31   ;;  %v109_v54 = vsel %vm101_vm0, %v38_v53, 0 }
  0x1a   :  { %326 = vperm.xlu1 %921, %v55_v32  }
  0x1d   :  { %847 = vmatpush3.bf16.xpose.msra.mxu0 %v121_v29  ;;  %442 = vperm.xlu0 %920, %v60_v33  }
  0x1e   :  { %912 = vmatprep.subr.msk.bf16.mxu0 %vm101_vm0, %v41_v30  ;;  %447 = vperm.xlu1 %921, %v61_v36  }
  0x21   :  { %432 = vperm.xlu0 %920, %v58_v39  }
  0x22   :  { %437 = vperm.xlu1 %921, %v59_v40  }
  0x25   :  { %849 = vmatpush3.bf16.xpose.msra.mxu0 %v118_v37  ;;  %553 = vperm.xlu0 %920, %v64_v41  }
  0x26   :  { %913 = vmatprep.subr.msk.bf16.mxu0 %vm101_vm0, %v40_v38  ;;  %558 = vperm.xlu1 %921, %v65_v44  }
  0x29   :  { %543 = vperm.xlu0 %920, %v62_v47  }
  0x2a   :  { %548 = vperm.xlu1 %921, %v63_v48  }
  0x2d   :  { %851 = vmatpush3.bf16.xpose.msra.mxu0 %v115_v45  ;;  %651 = vperm.xlu0 %920, %v66_v49  }
  0x2e   :  { %914 = vmatprep.subr.msk.bf16.mxu0 %vm101_vm0, %v39_v46 }
  0x35   :  { %853 = vmatpush3.bf16.xpose.msra.mxu0 %v112_v52 }
  0x36   :  { %915 = vmatprep.subr.msk.bf16.mxu0 %vm101_vm0, %v38_v53 }
  0x3d   :  { %855 = vmatpush3.bf16.xpose.msra.mxu0 %v109_v54 }
  0x44   :  { %857 = vmatmul.mubr.msk.bf16.vlgmr.msra.gmra.mxu0 %vm101_vm0, %v923_v55  ;;  %v927_v55 = vld [vmem:[%s1223_s1 + $0x28] sm:$0xff]  }
  0x80   :  { %v84_v57 = vpop.permute.xlu0 %83 }
  0x81   :  { %v74_v58 = vpop.permute.xlu1 %73 }
  0x84   :  { %v89_v0 = vpop.permute.xlu0 %88 }
  0x85   :  { %v79_v4 = vpop.permute.xlu1 %78 }
  0x88   :  { %v220_v25 = vpop.permute.xlu0 %219 }
  0x89   :  { %v225_v26 = vpop.permute.xlu1 %224 }
  0x8c   :  { %v210_v29 = vpop.permute.xlu0 %209 }
  0x8d   :  { %v215_v36 = vpop.permute.xlu1 %214 }
 0x104   :  { %v858_v59 = vpop.f32.mrf.mxu0 }
 0x105   :  { %v175_v60 = vadd.f32 %v858_v59, %v84_v57  ;;  %v332_v57 = vpop.permute.xlu0 %331 }
 0x106   :  { %v166_v61 = vpop.f32.mrf.mxu0 }
 0x107   :  { %v189_v62 = vmul.f32 1.442695, %v175_v60  ;;  %v167_v63 = vadd.f32 %v166_v61, %v74_v58  ;;  %vm183_vm2 = vcmp.gt.f32.partialorder %v175_v60, 0.0  ;;  %v337_v58 = vpop.permute.xlu1 %336 }
 0x108   :  { %v859_v1 = vpop.f32.mrf.mxu0 }
 0x109   :  { %932 = vpow2.f32 %v189_v62  ;;  %v185_v2 = vmul.f32 1.442695, %v167_v63  ;;  %v178_v3 = vadd.f32 %v859_v1, %v89_v0  ;;  %vm181_vm4 = vcmp.gt.f32.partialorder %v167_v63, 0.0  ;;  %v322_v61 = vpop.permute.xlu0 %321 }
 0x10a   :  { %v169_v5 = vpop.f32.mrf.mxu0 }
 0x10b   :  { %934 = vpow2.f32 %v185_v2  ;;  %v191_v6 = vmul.f32 1.442695, %v178_v3  ;;  %v170_v7 = vadd.f32 %v169_v5, %v79_v4  ;;  %vm184_vm3 = vcmp.gt.f32.partialorder %v178_v3, 0.0  ;;  %v327_v4 = vpop.permute.xlu1 %326 }
 0x10d   :  { %936 = vpow2.f32 %v191_v6  ;;  %v187_v8 = vmul.f32 1.442695, %v170_v7  ;;  %vm182_vm5 = vcmp.gt.f32.partialorder %v170_v7, 0.0 }
 0x10f   :  { %938 = vpow2.f32 %v187_v8 }
 0x116   :  { %v933_v9 = vpop.eup %932 }
 0x117   :  { %v772_v11 = vadd.f32 -1.0, %v933_v9 }
 0x118   :  { %v935_v10 = vpop.eup %934 }
 0x119   :  { %v770_v13 = vadd.f32 -1.0, %v935_v10  ;;  %v199_v17 = vsel %vm183_vm2, %v175_v60, %v772_v11 }
 0x11a   :  { %v937_v12 = vpop.eup %936 }
 0x11b   :  { %v773_v14 = vadd.f32 -1.0, %v937_v12  ;;  %v197_v20 = vsel %vm181_vm4, %v167_v63, %v770_v13 }
 0x11c   :  { %v939_v15 = vpop.eup %938 }
 0x11d   :  { %v771_v16 = vadd.f32 -1.0, %v939_v15  ;;  %v200_v18 = vsel %vm184_vm3, %v178_v3, %v773_v14  ;;  %vm1000_vm3 = vmmov 0  }
 0x11e   :  { %v206_v19 = vpack.c.bf16 %v200_v18, %v199_v17 }
 0x11f   :  { %v198_v21 = vsel %vm182_vm5, %v170_v7, %v771_v16 }
 0x120   :  { %860 = vmatprep.subr.bf16.mxu1 %v206_v19  ;;  %v205_v22 = vpack.c.bf16 %v198_v21, %v197_v20 }
 0x121   :  { %861 = vmatpush3.bf16.msra.mxu1 %v206_v19 }
 0x122   :  { %862 = vmatprep.subr.bf16.mxu1 %v205_v22 }
 0x125   :  { %863 = vmatpush3.bf16.msra.mxu1 %v205_v22 }
 0x128   :  { %865 = vmatmul.mubr.msk.bf16.vlgmr.msra.gmra.mxu1 %vm237_vm1, %v925_v23  ;;  %v929_v23 = vld [vmem:[%s1224_s2 + $0x8] sm:$0xff]  }
 0x129   :  { %872 = vmatprep.mubr.msk.bf16.mxu1 %vm237_vm1, %v926_v24  ;;  %v930_v24 = vld [vmem:[%s1224_s2 + $0x10] sm:$0xff]  }
 0x1e8   :  { %v866_v27 = vpop.f32.mrf.mxu1 }
 0x1e9   :  { %v287_v28 = vadd.f32 %v866_v27, %v220_v25  ;;  %v443_v25 = vpop.permute.xlu0 %442 }
 0x1ea   :  { %v278_v30 = vpop.f32.mrf.mxu1 }
 0x1eb   :  { %v301_v31 = vmul.f32 1.442695, %v287_v28  ;;  %v279_v32 = vadd.f32 %v278_v30, %v210_v29  ;;  %vm295_vm6 = vcmp.gt.f32.partialorder %v287_v28, 0.0 }
 0x1ec   :  { %v867_v33 = vpop.f32.mrf.mxu1 }
 0x1ed   :  { %940 = vpow2.f32 %v301_v31  ;;  %v297_v34 = vmul.f32 1.442695, %v279_v32  ;;  %v290_v35 = vadd.f32 %v867_v33, %v225_v26  ;;  %vm293_vm8 = vcmp.gt.f32.partialorder %v279_v32, 0.0  ;;  %v448_v26 = vpop.permute.xlu1 %447  ;;  %v433_v29 = vpop.permute.xlu0 %432 }
 0x1ee   :  { %v281_v37 = vpop.f32.mrf.mxu1 }
 0x1ef   :  { %942 = vpow2.f32 %v297_v34  ;;  %v303_v38 = vmul.f32 1.442695, %v290_v35  ;;  %v282_v39 = vadd.f32 %v281_v37, %v215_v36  ;;  %vm296_vm7 = vcmp.gt.f32.partialorder %v290_v35, 0.0 }
 0x1f1   :  { %944 = vpow2.f32 %v303_v38  ;;  %v299_v40 = vmul.f32 1.442695, %v282_v39  ;;  %vm294_vm9 = vcmp.gt.f32.partialorder %v282_v39, 0.0  ;;  %v438_v36 = vpop.permute.xlu1 %437 }
 0x1f3   :  { %946 = vpow2.f32 %v299_v40 }
 0x1fa   :  { %v941_v41 = vpop.eup %940 }
 0x1fb   :  { %v780_v43 = vadd.f32 -1.0, %v941_v41 }
 0x1fc   :  { %v943_v42 = vpop.eup %942 }
 0x1fd   :  { %v778_v45 = vadd.f32 -1.0, %v943_v42  ;;  %v311_v49 = vsel %vm295_vm6, %v287_v28, %v780_v43 }
 0x1fe   :  { %v945_v44 = vpop.eup %944 }
 0x1ff   :  { %v781_v46 = vadd.f32 -1.0, %v945_v44  ;;  %v309_v52 = vsel %vm293_vm8, %v279_v32, %v778_v45 }
 0x200   :  { %v947_v47 = vpop.eup %946 }
 0x201   :  { %v779_v48 = vadd.f32 -1.0, %v947_v47  ;;  %v312_v50 = vsel %vm296_vm7, %v290_v35, %v781_v46 }
 0x202   :  { %v318_v51 = vpack.c.bf16 %v312_v50, %v311_v49 }
 0x203   :  { %v310_v53 = vsel %vm294_vm9, %v282_v39, %v779_v48 }
 0x204   :  { %868 = vmatprep.subr.bf16.mxu1 %v318_v51  ;;  %v317_v54 = vpack.c.bf16 %v310_v53, %v309_v52 }
 0x205   :  { %869 = vmatpush3.bf16.msra.mxu1 %v318_v51 }
 0x206   :  { %870 = vmatprep.subr.bf16.mxu1 %v317_v54 }
 0x209   :  { %871 = vmatpush3.bf16.msra.mxu1 %v317_v54 }
 0x20c   :  { %873 = vmatmul.mubr.msk.bf16.vlgmr.msra.gmra.mxu1 %vm237_vm1, %v927_v55  ;;  %v931_v55 = vld [vmem:[%s1224_s2 + $0x18] sm:$0xff]  }
 0x20d   :  { %880 = vmatprep.mubr.msk.bf16.mxu1 %vm237_vm1, %v928_v56  ;;  %v999_v56 = vmov 0.0  }
 0x2cc   :  { %v874_v59 = vpop.f32.mrf.mxu1 }
 0x2cd   :  { %v398_v60 = vadd.f32 %v874_v59, %v332_v57  ;;  %v554_v57 = vpop.permute.xlu0 %553 }
 0x2ce   :  { %v389_v62 = vpop.f32.mrf.mxu1 }
 0x2cf   :  { %v412_v63 = vmul.f32 1.442695, %v398_v60  ;;  %v390_v0 = vadd.f32 %v389_v62, %v322_v61  ;;  %vm406_vm10 = vcmp.gt.f32.partialorder %v398_v60, 0.0 }
 0x2d0   :  { %v875_v1 = vpop.f32.mrf.mxu1 }
 0x2d1   :  { %948 = vpow2.f32 %v412_v63  ;;  %v408_v2 = vmul.f32 1.442695, %v390_v0  ;;  %v401_v3 = vadd.f32 %v875_v1, %v337_v58  ;;  %vm404_vm12 = vcmp.gt.f32.partialorder %v390_v0, 0.0  ;;  %v559_v58 = vpop.permute.xlu1 %558  ;;  %v544_v61 = vpop.permute.xlu0 %543 }
 0x2d2   :  { %v392_v5 = vpop.f32.mrf.mxu1 }
 0x2d3   :  { %950 = vpow2.f32 %v408_v2  ;;  %v414_v6 = vmul.f32 1.442695, %v401_v3  ;;  %v393_v7 = vadd.f32 %v392_v5, %v327_v4  ;;  %vm407_vm11 = vcmp.gt.f32.partialorder %v401_v3, 0.0 }
 0x2d5   :  { %952 = vpow2.f32 %v414_v6  ;;  %v410_v8 = vmul.f32 1.442695, %v393_v7  ;;  %vm405_vm13 = vcmp.gt.f32.partialorder %v393_v7, 0.0  ;;  %v549_v4 = vpop.permute.xlu1 %548 }
 0x2d7   :  { %954 = vpow2.f32 %v410_v8 }
 0x2de   :  { %v949_v9 = vpop.eup %948 }
 0x2df   :  { %v788_v11 = vadd.f32 -1.0, %v949_v9 }
 0x2e0   :  { %v951_v10 = vpop.eup %950 }
 0x2e1   :  { %v786_v13 = vadd.f32 -1.0, %v951_v10  ;;  %v422_v17 = vsel %vm406_vm10, %v398_v60, %v788_v11 }
 0x2e2   :  { %v953_v12 = vpop.eup %952 }
 0x2e3   :  { %v789_v14 = vadd.f32 -1.0, %v953_v12  ;;  %v420_v20 = vsel %vm404_vm12, %v390_v0, %v786_v13 }
 0x2e4   :  { %v955_v15 = vpop.eup %954 }
 0x2e5   :  { %v787_v16 = vadd.f32 -1.0, %v955_v15  ;;  %v423_v18 = vsel %vm407_vm11, %v401_v3, %v789_v14 }
 0x2e6   :  { %v1187_v19 = vpack.c.bf16 %v423_v18, %v422_v17 }
 0x2e7   :  { %v421_v21 = vsel %vm405_vm13, %v393_v7, %v787_v16 }
 0x2e8   :  { %876 = vmatprep.subr.bf16.mxu1 %v1187_v19  ;;  %v1190_v22 = vpack.c.bf16 %v421_v21, %v420_v20 }
 0x2e9   :  { %877 = vmatpush3.bf16.msra.mxu1 %v1187_v19 }
 0x2ea   :  { %878 = vmatprep.subr.bf16.mxu1 %v1190_v22 }
 0x2ed   :  { %879 = vmatpush3.bf16.msra.mxu1 %v1190_v22 }
 0x2f0   :  { %881 = vmatmul.mubr.msk.bf16.vlgmr.msra.gmra.mxu1 %vm237_vm1, %v929_v23 }
 0x2f1   :  { %888 = vmatprep.mubr.msk.bf16.mxu1 %vm237_vm1, %v930_v24 }
 0x3b0   :  { %v882_v27 = vpop.f32.mrf.mxu1 }
 0x3b1   :  { %v509_v28 = vadd.f32 %v882_v27, %v443_v25  ;;  %v646_v25 = vld [vmem:[%s1225_s3] sm:$0xf] }
 0x3b2   :  { %v500_v30 = vpop.f32.mrf.mxu1 }
 0x3b3   :  { %v523_v31 = vmul.f32 1.442695, %v509_v28  ;;  %v501_v32 = vadd.f32 %v500_v30, %v433_v29  ;;  %vm517_vm14 = vcmp.gt.f32.partialorder %v509_v28, 0.0  ;;  %v652_v30 = vpop.permute.xlu0 %651 }
 0x3b4   :  { %v883_v33 = vpop.f32.mrf.mxu1 }
 0x3b5   :  { %956 = vpow2.f32 %v523_v31  ;;  %v519_v34 = vmul.f32 1.442695, %v501_v32  ;;  %v512_v35 = vadd.f32 %v883_v33, %v448_v26  ;;  %vm515_vm0 = vcmp.gt.f32.partialorder %v501_v32, 0.0  ;;  %v697_v26 = vld [vmem:[%s1225_s3 + $0x4] sm:$0xf]  ;;  %s1001_s3 = smov [#allocation2]  }
 0x3b6   :  { %v503_v37 = vpop.f32.mrf.mxu1  ;;  %s758_s12 = sshll.u32 %s1001_s3, 4  ;;  %s759_s12 = int_to_ptr.vmem [resolvable:$true] %s758_s12 }
 0x3b7   :  { %958 = vpow2.f32 %v519_v34  ;;  %v525_v38 = vmul.f32 1.442695, %v512_v35  ;;  %v504_v39 = vadd.f32 %v503_v37, %v438_v36  ;;  %vm518_vm15 = vcmp.gt.f32.partialorder %v512_v35, 0.0  ;;  %s976_s13 = scalar_lea.vmem %s759_s12, 128  ;;  %p981_p1 = scmp.lt.s32.totalorder %s759_s12, %s759_s12 }
 0x3b8   :  { %p977_p0 = scmp.ne.s32.totalorder %s759_s12, %s976_s13  ;;  %p982_p2 = scmp.lt.s32.totalorder %s976_s13, %s976_s13 }
 0x3b9   :  { %960 = vpow2.f32 %v525_v38  ;;  %v521_v40 = vmul.f32 1.442695, %v504_v39  ;;  %vm516_vm2 = vcmp.gt.f32.partialorder %v504_v39, 0.0 }
 0x3ba   :  { %p983_p3 = por %p982_p2, %p981_p1 }
 0x3bb   :  { %962 = vpow2.f32 %v521_v40  ;;  %v742_v40 = vlaneseq }
 0x3bc   :  { %p984_p4 = pnand %p983_p3, %p977_p0 }
 0x3c2   :  { %v957_v41 = vpop.eup %956 }
 0x3c3   :  { %v796_v43 = vadd.f32 -1.0, %v957_v41  ;;  %v743_v41 = vshrl.u32 %v742_v40, 7 }
 0x3c4   :  { %v959_v42 = vpop.eup %958 }
 0x3c5   :  { %v794_v45 = vadd.f32 -1.0, %v959_v42  ;;  %v533_v49 = vsel %vm517_vm14, %v509_v28, %v796_v43 }
 0x3c6   :  { %v961_v44 = vpop.eup %960 }
 0x3c7   :  { %v797_v46 = vadd.f32 -1.0, %v961_v44  ;;  %v531_v52 = vsel %vm515_vm0, %v501_v32, %v794_v45 }
 0x3c8   :  { %v963_v47 = vpop.eup %962 }
 0x3c9   :  { %v795_v48 = vadd.f32 -1.0, %v963_v47  ;;  %v534_v50 = vsel %vm518_vm15, %v512_v35, %v797_v46 }
 0x3ca   :  { %v540_v51 = vpack.c.bf16 %v534_v50, %v533_v49 }
 0x3cb   :  { %v532_v53 = vsel %vm516_vm2, %v504_v39, %v795_v48 }
 0x3cc   :  { %884 = vmatprep.subr.bf16.mxu1 %v540_v51  ;;  %v539_v54 = vpack.c.bf16 %v532_v53, %v531_v52 }
 0x3cd   :  { %885 = vmatpush3.bf16.msra.mxu1 %v540_v51 }
 0x3ce   :  { %886 = vmatprep.subr.bf16.mxu1 %v539_v54 }
 0x3d1   :  { %887 = vmatpush3.bf16.msra.mxu1 %v539_v54 }
 0x3d2   :  { %892 = vmatprep.subr.bf16.mxu1 %v999_v56 }
 0x3d4   :  { %889 = vmatmul.mubr.msk.bf16.vlgmr.msra.gmra.mxu1 %vm237_vm1, %v931_v55 }
 0x3d5   :  { %896 = vmatprep.mubr.msk.bf16.mxu1 %vm1000_vm3, %v999_v56 }
 0x494   :  { %v890_v59 = vpop.f32.mrf.mxu1 }
 0x495   :  { %v620_v60 = vadd.f32 %v890_v59, %v554_v57 }
 0x496   :  { %v611_v62 = vpop.f32.mrf.mxu1 }
 0x497   :  { %v634_v63 = vmul.f32 1.442695, %v620_v60  ;;  %v612_v0 = vadd.f32 %v611_v62, %v544_v61  ;;  %vm628_vm4 = vcmp.gt.f32.partialorder %v620_v60, 0.0 }
 0x498   :  { %v891_v1 = vpop.f32.mrf.mxu1 }
 0x499   :  { %964 = vpow2.f32 %v634_v63  ;;  %v630_v2 = vmul.f32 1.442695, %v612_v0  ;;  %v623_v3 = vadd.f32 %v891_v1, %v559_v58  ;;  %vm626_vm7 = vcmp.gt.f32.partialorder %v612_v0, 0.0 }
 0x49a   :  { %v614_v5 = vpop.f32.mrf.mxu1 }
 0x49b   :  { %v636_v6 = vmul.f32 1.442695, %v623_v3  ;;  %v615_v7 = vadd.f32 %v614_v5, %v549_v4  ;;  %966 = vpow2.f32 %v630_v2  ;;  %vm629_vm5 = vcmp.gt.f32.partialorder %v623_v3, 0.0 }
 0x49d   :  { %968 = vpow2.f32 %v636_v6  ;;  %v632_v8 = vmul.f32 1.442695, %v615_v7  ;;  %vm627_vm6 = vcmp.gt.f32.partialorder %v615_v7, 0.0 }
 0x49f   :  { %970 = vpow2.f32 %v632_v8 }
 0x4a6   :  { %v965_v9 = vpop.eup %964 }
 0x4a7   :  { %v804_v11 = vadd.f32 -1.0, %v965_v9 }
 0x4a8   :  { %v967_v10 = vpop.eup %966 }
 0x4a9   :  { %v644_v15 = vsel %vm628_vm4, %v620_v60, %v804_v11  ;;  %v802_v16 = vadd.f32 -1.0, %v967_v10 }
 0x4aa   :  { %v969_v12 = vpop.eup %968 }
 0x4ab   :  { %v805_v13 = vadd.f32 -1.0, %v969_v12  ;;  %v642_v23 = vsel %vm626_vm7, %v612_v0, %v802_v16 }
 0x4ac   :  { %v971_v14 = vpop.eup %970 }
 0x4ad   :  { %v645_v17 = vsel %vm629_vm5, %v623_v3, %v805_v13  ;;  %v803_v18 = vadd.f32 -1.0, %v971_v14 }
 0x4ae   :  { %v648_v20 = vpack.c.bf16 %v645_v17, %v644_v15 }
 0x4af   :  { %v643_v21 = vsel %vm627_vm6, %v615_v7, %v803_v18 }
 0x4b0   :  { %893 = vmatpush3.bf16.msra.mxu1 %v648_v20  ;;  %v647_v24 = vpack.c.bf16 %v643_v21, %v642_v23 }
 0x4b1   :  { %894 = vmatprep.subr.bf16.mxu1 %v999_v56 }
 0x4b4   :  { %895 = vmatpush3.bf16.msra.mxu1 %v647_v24 }
 0x4b5   :  { %900 = vmatprep.subr.bf16.mxu1 %v999_v56 }
 0x4b7   :  { %897 = vmatmul.mubr.msk.bf16.vlgmr.msra.gmra.mxu1 %vm237_vm1, %v646_v25 }
 0x4b8   :  { %901 = vmatpush3.bf16.msra.mxu1 %v1187_v19  ;;  %904 = vmatprep.mubr.msk.bf16.mxu1 %vm1000_vm3, %v999_v56 }
 0x4b9   :  { %902 = vmatprep.subr.bf16.mxu1 %v999_v56 }
 0x4bc   :  { %903 = vmatpush3.bf16.msra.mxu1 %v1190_v22 }
 0x4bf   :  { %905 = vmatmul.mubr.msk.bf16.vlgmr.msra.gmra.mxu1 %vm237_vm1, %v697_v26  ;;  %vm749_vm1 = vcmp.eq.s32.totalorder %v743_v41, 2 }
 0x577   :  { %v691_v27 = vpop.f32.mrf.mxu1 }
 0x578   :  { %v692_v32 = vadd.f32 %v691_v27, %v652_v30 }
 0x579   :  { %v898_v28 = vpop.f32.mrf.mxu1 }
 0x57b   :  { %v694_v29 = vpop.f32.mrf.mxu1 }
 0x57d   :  { %v899_v31 = vpop.f32.mrf.mxu1 }
 0x57f   :  { %v735_v33 = vpop.f32.mrf.mxu1 }
 0x580   :  { %v741_v34 = vadd.f32 %v735_v33, %v692_v32 }
 0x581   :  { %v906_v19 = vpop.f32.mrf.mxu1 }
 0x582   :  { %v744_v35 = vsub.f32 0.0, %v741_v34 }
 0x583   :  { %v738_v36 = vpop.f32.mrf.mxu1 }
 0x584   :  { %v745_v37 = vmul.f32 1.442695, %v744_v35 }
 0x585   :  { %v907_v38 = vpop.f32.mrf.mxu1 }
 0x586   :  { %972 = vpow2.f32 %v745_v37 }
 0x593   :  { %v973_v22 = vpop.eup %972 }
 0x594   :  { %v747_v39 = vadd.f32 1.0, %v973_v22 }
 0x596   :  { %974 = vrcp.f32 %v747_v39 }
 0x5a3   :  { %v975_v42 = vpop.eup %974 }
 0x5a4   :  { %v750_v43 = vsel %vm749_vm1, %v975_v42, %v741_v34 }
 0x5a5   :  { %751 = vst [vmem:[#allocation2] sm:$0xff] %v750_v43 }
 0x5a6   :  { %987 = shalt.err (!%p984_p4)
}
 0x5a7   :  { %761 = dma.vmem_to_hbm [thread:$0]  %s759_s12, 128, %s1227_s5, [#allocation3]  }
 0x5a8   :  { %996 = dma.done.wait [#allocation3], 128  }
 0x5a9   :  { %997 = vsyncadd [#allocation3], 4294967168 }
 0x5aa   :  { %765 = vsyncpa [#allocation3], 1 }

</bundles_post_ra>
